<compile_context>
chip_gen: v7x
topology: tpu7x:2x2x1
jax: 0.10.0
libtpu: 0.0.40
codegen_flags: <defaults>
</compile_context>

<pallas_src>
import jax
import jax.numpy as jnp
from jax import lax
from jax.experimental import pallas as pl
from jax.experimental.pallas import tpu as pltpu


def _round_up(a, m):
    return (a + m - 1) // m * m


# ---------------------------------------------------------------------------
# Fused kernel: node MLP (node-on-lanes, bf16) + in-kernel first-k mean pooling
# accumulated over node tiles + collapsed conv head epilogue on the last step.
# ---------------------------------------------------------------------------
def _seal_fused_kernel(xT_ref, w1_ref, wpk_ref, bpk_ref,
                       start_ref, stop_ref, inv_ref,
                       c1w_ref, c1b_ref, c2w_ref, c2b_ref, wd_ref, bd_ref,
                       out_ref, acc_ref):
    step = pl.program_id(0)
    emb = w1_ref.shape[0]

    @pl.when(step == 0)
    def _init():
        acc_ref[...] = jnp.zeros_like(acc_ref)

    # ---- node MLP, transposed (node-on-lanes) layout, bf16 MXU, f32 accum ---
    x_t = xT_ref[...]                                          # (F, tn) bf16
    b1 = bpk_ref[0:emb, :]                                     # (emb, 1) f32
    b2 = bpk_ref[emb:2 * emb, :]
    b3 = bpk_ref[2 * emb:3 * emb, :]
    b4 = bpk_ref[3 * emb:3 * emb + 1, :]                       # (1, 1)

    h = jnp.dot(w1_ref[...], x_t, preferred_element_type=jnp.float32)
    h = jnp.maximum(h + b1, 0.0).astype(jnp.bfloat16)          # (emb, tn)
    h = jnp.dot(wpk_ref[0:emb, :], h, preferred_element_type=jnp.float32)
    h = jnp.maximum(h + b2, 0.0).astype(jnp.bfloat16)
    h = jnp.dot(wpk_ref[emb:2 * emb, :], h, preferred_element_type=jnp.float32)
    h = jnp.maximum(h + b3, 0.0).astype(jnp.bfloat16)
    h4 = jnp.dot(wpk_ref[2 * emb:2 * emb + 1, :], h,
                 preferred_element_type=jnp.float32)
    h4 = jnp.maximum(h4 + b4, 0.0)                             # (1, tn) f32

    # ---- first-k mean pooling: mask built in-kernel from O(B) window params -
    tn = x_t.shape[1]
    num_g = start_ref.shape[0]
    nid = lax.broadcasted_iota(jnp.int32, (num_g, tn), 1) + step * tn
    sel = (nid >= start_ref[...]) & (nid < stop_ref[...])      # (B, tn)
    w = jnp.where(sel, inv_ref[...], 0.0)                      # (B, tn) f32
    # per-graph partial mean: elementwise mult + cross-lane sum (XLU slot).
    acc_ref[...] += jnp.sum(w * h4, axis=1, keepdims=True)     # (B, 1)

    # ---- collapsed conv head, fused into the last reduction step ------------
    # Because the per-graph conv input is a constant sequence (broadcast of one
    # pooled scalar), Conv1d / MaxPool1d / Conv1d / Linear collapse exactly to
    # three tiny matmuls against tap/position-summed weights (built in glue).
    @pl.when(step == pl.num_programs(0) - 1)
    def _epilogue():
        pooled = acc_ref[...]                                            # (B, 1)
        g1 = jnp.maximum(pooled * c1w_ref[...] + c1b_ref[...], 0.0)      # (B, 16)
        g2 = jnp.maximum(jnp.dot(g1, c2w_ref[...],
                                 preferred_element_type=jnp.float32)
                         + c2b_ref[...], 0.0)                            # (B, 32)
        out_ref[...] = (jnp.dot(g2, wd_ref[...],
                                preferred_element_type=jnp.float32)
                        + bd_ref[...])                                   # (B, 128)


# ---------------------------------------------------------------------------
# Glue: parameters (kernel layouts + collapsed conv head), forward wrapper.
# ---------------------------------------------------------------------------
def init_seal_params(key, num_features, embedding_dim, *, k=30, output_dim=2,
                     out_pad=128):
    total_latent = 3 * embedding_dim + 1            # sum(latent_dim), latent_dim[-1]=1
    ks1 = min(5, total_latent)
    ks2 = min(5, total_latent // 2)
    c1, c2 = 16, 32
    dense_seq = max(max((k - 2) // 2 + 1, 1) - 5 + 1, 1)   # as in DGCNN.__init__
    dense_dim = dense_seq * c2
    l2 = dense_seq

    keys = jax.random.split(key, 16)
    rnd = lambda kk, shape: 0.1 * jax.random.normal(kk, shape, jnp.float32)

    # Reference-layout weights.
    w1 = rnd(keys[0], (num_features, embedding_dim)); b1 = rnd(keys[1], (1, embedding_dim))
    w2 = rnd(keys[2], (embedding_dim, embedding_dim)); b2 = rnd(keys[3], (1, embedding_dim))
    w3 = rnd(keys[4], (embedding_dim, embedding_dim)); b3 = rnd(keys[5], (1, embedding_dim))
    w4 = rnd(keys[6], (embedding_dim, 1)); b4 = rnd(keys[7], (1, 1))
    w_c1 = rnd(keys[8], (c1, 1, ks1)); b_c1 = rnd(keys[9], (c1,))
    w_c2 = rnd(keys[10], (c2, c1, ks2)); b_c2 = rnd(keys[11], (c2,))
    w_out = rnd(keys[12], (output_dim, dense_dim)); b_out = rnd(keys[13], (output_dim,))

    # Kernel-layout node MLP: transposed weights in bf16 (MXU native rate),
    # biases in f32; layers 2..4 and all biases packed along sublanes.
    p = {
        "w1T": jnp.transpose(w1).astype(jnp.bfloat16),                          # (emb, F)
        "wpk": jnp.concatenate([jnp.transpose(w2), jnp.transpose(w3),
                                jnp.transpose(w4)], axis=0).astype(jnp.bfloat16),  # (2emb+1, emb)
        "bpk": jnp.concatenate([jnp.transpose(b1), jnp.transpose(b2),
                                jnp.transpose(b3), jnp.transpose(b4)], axis=0),    # (3emb+1, 1)
        # Collapsed conv head (constant-sequence algebra):
        #   Conv1d(1->c1, ks1)   -> per-output-channel tap-summed weights (1, c1)
        #   MaxPool1d(2, 2)      -> identity on a constant sequence
        #   Conv1d(c1->c2, ks2)  -> tap-summed (c1, c2) matmul
        #   Linear(dense_dim->o) -> position-summed (c2, o) matmul (torch flattens
        #                           (B, c2, l2) channel-major: col = c*l2 + t)
        "c1w": jnp.sum(w_c1, axis=(1, 2))[None, :],                             # (1, c1)
        "c1b": b_c1[None, :],                                                   # (1, c1)
        "c2w": jnp.transpose(jnp.sum(w_c2, axis=2)),                            # (c1, c2)
        "c2b": b_c2[None, :],                                                   # (1, c2)
        "wd": jnp.zeros((c2, out_pad), jnp.float32).at[:, :output_dim].set(
            jnp.transpose(jnp.sum(w_out.reshape(output_dim, c2, l2), axis=2))), # (c2, 128)
        "bd": jnp.zeros((1, out_pad), jnp.float32).at[:, :output_dim].set(b_out),
    }
    cfg = dict(k=k, output_dim=output_dim, out_pad=out_pad,
               embedding_dim=embedding_dim)
    return p, cfg


def seal_forward(p, cfg, x, edge_index, batch, *, num_graphs, tile_n=2048):
    del edge_index  # unused by the reference SEAL/DGCNN forward
    n, f = x.shape
    out_pad = cfg["out_pad"]

    # Per-graph first-k mean-pool windows: O(B) bytes instead of a dense (B, N)
    # pooling matrix.  Assumes the usual contiguous, sorted PyG-style `batch`
    # vector (all nodes of graph g occupy one contiguous index range), which
    # matches the reference's h[batch == i][:k] selection for such batches.
    max_nodes = n // num_graphs if n > 0 else 1
    k_run = min(cfg["k"], max_nodes)
    counts = jax.ops.segment_sum(jnp.ones((n,), jnp.int32), batch,
                                 num_segments=num_graphs)
    starts = (jnp.cumsum(counts) - counts).astype(jnp.int32)
    keff = jnp.minimum(counts, jnp.int32(k_run))
    stops = (starts + keff).astype(jnp.int32)
    inv = 1.0 / jnp.maximum(keff, 1).astype(jnp.float32)
    starts, stops, inv = starts[:, None], stops[:, None], inv[:, None]   # (B, 1)

    # Node features: node-on-lanes layout, bf16 (halves HBM bytes, bf16 MXU).
    xT = jnp.transpose(x).astype(jnp.bfloat16)                           # (F, N)

    # Node tile: full N when small, else a large 128-aligned lane tile to
    # amortize per-grid-step overhead.  Padded node columns get zero pool
    # weight (their ids fall outside every [start, stop) window), so exact.
    if n <= tile_n:
        tn, n_pad = n, n
    else:
        tn = _round_up(min(tile_n, n), 128)
        n_pad = _round_up(n, tn)
        xT = jnp.pad(xT, ((0, 0), (0, n_pad - n)))
    grid = (n_pad // tn,)

    def full(a):
        return pl.BlockSpec(a.shape, lambda i, _a=a: (0,) * _a.ndim)

    out = pl.pallas_call(
        _seal_fused_kernel,
        out_shape=jax.ShapeDtypeStruct((num_graphs, out_pad), jnp.float32),
        grid=grid,
        in_specs=[
            pl.BlockSpec((f, tn), lambda i: (0, i)),      # streamed node tiles
            full(p["w1T"]), full(p["wpk"]), full(p["bpk"]),
            full(starts), full(stops), full(inv),
            full(p["c1w"]), full(p["c1b"]), full(p["c2w"]), full(p["c2b"]),
            full(p["wd"]), full(p["bd"]),
        ],
        out_specs=pl.BlockSpec((num_graphs, out_pad), lambda i: (0, 0)),
        scratch_shapes=[pltpu.VMEM((num_graphs, 1), jnp.float32)],
        compiler_params=pltpu.CompilerParams(dimension_semantics=("arbitrary",)),
    )(xT, p["w1T"], p["wpk"], p["bpk"], starts, stops, inv,
      p["c1w"], p["c1b"], p["c2w"], p["c2b"], p["wd"], p["bd"])

    # TODO(synk): with the module's own sizes the PyTorch reference would hit a
    # zero-length MaxPool1d output after adaptive_avg_pool1d(., 5)+Conv1d(ks=5);
    # as in the previous version we use the constant-broadcast sequence length
    # implied by self.dense_dim, under which the conv head collapses exactly to
    # the fused epilogue above.
    return out[:, :cfg["output_dim"]]


if __name__ == "__main__":
    NUM_FEATURES = 16
    EMBEDDING_DIM = 32
    NUM_NODES = 64
    NUM_GRAPHS = 2

    key = jax.random.PRNGKey(0)
    k_param, k_x, k_e = jax.random.split(key, 3)
    params, cfg = init_seal_params(k_param, NUM_FEATURES, EMBEDDING_DIM,
                                   k=30, output_dim=2)

    x = jax.random.normal(k_x, (NUM_NODES, NUM_FEATURES), jnp.float32)
    batch = jnp.repeat(jnp.arange(NUM_GRAPHS, dtype=jnp.int32),
                       NUM_NODES // NUM_GRAPHS)
    edge_index = jax.random.randint(k_e, (2, 128), 0, NUM_NODES, dtype=jnp.int32)

    out = seal_forward(params, cfg, x, edge_index, batch, num_graphs=NUM_GRAPHS)
    out = jax.block_until_ready(out)
    assert out.shape == (NUM_GRAPHS, 2) and out.dtype == jnp.float32
    print("KERNEL_OK")
</pallas_src>

<mosaic_0001>
module attributes {stable_mosaic.version = 11 : i64} {
  func.func @_seal_fused_kernel(%arg0: i32, %arg1: memref<16x64xbf16, #tpu.memory_space<vmem>>, %arg2: memref<32x16xbf16, #tpu.memory_space<vmem>>, %arg3: memref<65x32xbf16, #tpu.memory_space<vmem>>, %arg4: memref<97x1xf32, #tpu.memory_space<vmem>>, %arg5: memref<2x1xi32, #tpu.memory_space<vmem>>, %arg6: memref<2x1xi32, #tpu.memory_space<vmem>>, %arg7: memref<2x1xf32, #tpu.memory_space<vmem>>, %arg8: memref<1x16xf32, #tpu.memory_space<vmem>>, %arg9: memref<1x16xf32, #tpu.memory_space<vmem>>, %arg10: memref<16x32xf32, #tpu.memory_space<vmem>>, %arg11: memref<1x32xf32, #tpu.memory_space<vmem>>, %arg12: memref<32x128xf32, #tpu.memory_space<vmem>>, %arg13: memref<1x128xf32, #tpu.memory_space<vmem>>, %arg14: memref<2x128xf32, #tpu.memory_space<vmem>>, %arg15: memref<2x1xf32, #tpu.memory_space<vmem>>) attributes {dimension_semantics = [#tpu.dimension_semantics<arbitrary>], iteration_bounds = array<i64: 1>, scalar_prefetch = 0 : i64, scratch_operands = 1 : i64, tpu.core_type = #tpu.core_type<tc>, window_params = [{transform_indices = @transform_0, window_bounds = array<i64: 16, 64>}, {pipeline_mode = #tpu.pipeline_mode<synchronous>, transform_indices = @transform_1, window_bounds = array<i64: 32, 16>}, {pipeline_mode = #tpu.pipeline_mode<synchronous>, transform_indices = @transform_2, window_bounds = array<i64: 65, 32>}, {pipeline_mode = #tpu.pipeline_mode<synchronous>, transform_indices = @transform_3, window_bounds = array<i64: 97, 1>}, {pipeline_mode = #tpu.pipeline_mode<synchronous>, transform_indices = @transform_4, window_bounds = array<i64: 2, 1>}, {pipeline_mode = #tpu.pipeline_mode<synchronous>, transform_indices = @transform_5, window_bounds = array<i64: 2, 1>}, {pipeline_mode = #tpu.pipeline_mode<synchronous>, transform_indices = @transform_6, window_bounds = array<i64: 2, 1>}, {pipeline_mode = #tpu.pipeline_mode<synchronous>, transform_indices = @transform_7, window_bounds = array<i64: 1, 16>}, {pipeline_mode = #tpu.pipeline_mode<synchronous>, transform_indices = @transform_8, window_bounds = array<i64: 1, 16>}, {pipeline_mode = #tpu.pipeline_mode<synchronous>, transform_indices = @transform_9, window_bounds = array<i64: 16, 32>}, {pipeline_mode = #tpu.pipeline_mode<synchronous>, transform_indices = @transform_10, window_bounds = array<i64: 1, 32>}, {pipeline_mode = #tpu.pipeline_mode<synchronous>, transform_indices = @transform_11, window_bounds = array<i64: 32, 128>}, {pipeline_mode = #tpu.pipeline_mode<synchronous>, transform_indices = @transform_12, window_bounds = array<i64: 1, 128>}, {pipeline_mode = #tpu.pipeline_mode<synchronous>, transform_indices = @transform_13, window_bounds = array<i64: 2, 128>}]} {
    %c0_i32 = arith.constant 0 : i32
    %0 = arith.cmpi eq, %arg0, %c0_i32 : i32
    %1 = arith.extui %0 : i1 to i32
    %c0_i32_0 = arith.constant 0 : i32
    %2 = arith.cmpi ne, %1, %c0_i32_0 : i32
    scf.if %2 {
      %cst_36 = arith.constant 0.000000e+00 : f32
      %61 = vector.broadcast %cst_36 : f32 to vector<2x1xf32>
      %c0_37 = arith.constant 0 : index
      %c0_38 = arith.constant 0 : index
      %62 = vector.load %arg15[%c0_37, %c0_38] : memref<2x1xf32, #tpu.memory_space<vmem>>, vector<2x1xf32>
      tpu.vector_store %arg15[%c0_37, %c0_38], %61 {strides = array<i32>} : memref<2x1xf32, #tpu.memory_space<vmem>>, vector<2x1xf32>,
    } else {
    }
    %c0 = arith.constant 0 : index
    %c0_1 = arith.constant 0 : index
    %3 = vector.load %arg1[%c0, %c0_1] : memref<16x64xbf16, #tpu.memory_space<vmem>>, vector<16x64xbf16>
    %c0_2 = arith.constant 0 : index
    %c0_3 = arith.constant 0 : index
    %4 = vector.load %arg4[%c0_2, %c0_3] : memref<97x1xf32, #tpu.memory_space<vmem>>, vector<32x1xf32>
    %c32 = arith.constant 32 : index
    %c0_4 = arith.constant 0 : index
    %5 = vector.load %arg4[%c32, %c0_4] : memref<97x1xf32, #tpu.memory_space<vmem>>, vector<32x1xf32>
    %c64 = arith.constant 64 : index
    %c0_5 = arith.constant 0 : index
    %6 = vector.load %arg4[%c64, %c0_5] : memref<97x1xf32, #tpu.memory_space<vmem>>, vector<32x1xf32>
    %c96 = arith.constant 96 : index
    %c0_6 = arith.constant 0 : index
    %7 = vector.load %arg4[%c96, %c0_6] : memref<97x1xf32, #tpu.memory_space<vmem>>, vector<1x1xf32>
    %c0_7 = arith.constant 0 : index
    %c0_8 = arith.constant 0 : index
    %8 = vector.load %arg2[%c0_7, %c0_8] : memref<32x16xbf16, #tpu.memory_space<vmem>>, vector<32x16xbf16>
    %cst = arith.constant dense<0.000000e+00> : vector<32x64xf32>
    %9 = tpu.matmul %8, %3, %cst {dimension_numbers = #tpu.dot_dimension_numbers<[1], [0], [0], [1], [0, 0, 1, 1], [], []>} : vector<32x16xbf16>, vector<16x64xbf16>, vector<32x64xf32> -> vector<32x64xf32>
    %10 = vector.broadcast %4 : vector<32x1xf32> to vector<32x64xf32>
    %11 = arith.addf %9, %10 : vector<32x64xf32>
    %cst_9 = arith.constant 0.000000e+00 : f32
    %12 = vector.broadcast %cst_9 : f32 to vector<32x64xf32>
    %13 = arith.maximumf %11, %12 : vector<32x64xf32>
    %14 = arith.truncf %13 : vector<32x64xf32> to vector<32x64xbf16>
    %c0_10 = arith.constant 0 : index
    %c0_11 = arith.constant 0 : index
    %15 = vector.load %arg3[%c0_10, %c0_11] : memref<65x32xbf16, #tpu.memory_space<vmem>>, vector<32x32xbf16>
    %cst_12 = arith.constant dense<0.000000e+00> : vector<32x64xf32>
    %16 = tpu.matmul %15, %14, %cst_12 {dimension_numbers = #tpu.dot_dimension_numbers<[1], [0], [0], [1], [0, 0, 1, 1], [], []>} : vector<32x32xbf16>, vector<32x64xbf16>, vector<32x64xf32> -> vector<32x64xf32>
    %17 = vector.broadcast %5 : vector<32x1xf32> to vector<32x64xf32>
    %18 = arith.addf %16, %17 : vector<32x64xf32>
    %cst_13 = arith.constant 0.000000e+00 : f32
    %19 = vector.broadcast %cst_13 : f32 to vector<32x64xf32>
    %20 = arith.maximumf %18, %19 : vector<32x64xf32>
    %21 = arith.truncf %20 : vector<32x64xf32> to vector<32x64xbf16>
    %c32_14 = arith.constant 32 : index
    %c0_15 = arith.constant 0 : index
    %22 = vector.load %arg3[%c32_14, %c0_15] : memref<65x32xbf16, #tpu.memory_space<vmem>>, vector<32x32xbf16>
    %cst_16 = arith.constant dense<0.000000e+00> : vector<32x64xf32>
    %23 = tpu.matmul %22, %21, %cst_16 {dimension_numbers = #tpu.dot_dimension_numbers<[1], [0], [0], [1], [0, 0, 1, 1], [], []>} : vector<32x32xbf16>, vector<32x64xbf16>, vector<32x64xf32> -> vector<32x64xf32>
    %24 = vector.broadcast %6 : vector<32x1xf32> to vector<32x64xf32>
    %25 = arith.addf %23, %24 : vector<32x64xf32>
    %cst_17 = arith.constant 0.000000e+00 : f32
    %26 = vector.broadcast %cst_17 : f32 to vector<32x64xf32>
    %27 = arith.maximumf %25, %26 : vector<32x64xf32>
    %28 = arith.truncf %27 : vector<32x64xf32> to vector<32x64xbf16>
    %c64_18 = arith.constant 64 : index
    %c0_19 = arith.constant 0 : index
    %29 = vector.load %arg3[%c64_18, %c0_19] : memref<65x32xbf16, #tpu.memory_space<vmem>>, vector<1x32xbf16>
    %cst_20 = arith.constant dense<0.000000e+00> : vector<1x64xf32>
    %30 = tpu.matmul %29, %28, %cst_20 {dimension_numbers = #tpu.dot_dimension_numbers<[1], [0], [0], [1], [0, 0, 1, 1], [], []>} : vector<1x32xbf16>, vector<32x64xbf16>, vector<1x64xf32> -> vector<1x64xf32>
    %31 = vector.broadcast %7 : vector<1x1xf32> to vector<1x64xf32>
    %32 = arith.addf %30, %31 : vector<1x64xf32>
    %cst_21 = arith.constant 0.000000e+00 : f32
    %33 = vector.broadcast %cst_21 : f32 to vector<1x64xf32>
    %34 = arith.maximumf %32, %33 : vector<1x64xf32>
    %35 = tpu.iota {dimensions = array<i32: 1>} : vector<2x64xi32>
    %c64_i32 = arith.constant 64 : i32
    %36 = arith.muli %arg0, %c64_i32 : i32
    %37 = vector.broadcast %36 : i32 to vector<2x64xi32>
    %38 = arith.addi %35, %37 : vector<2x64xi32>
    %c0_22 = arith.constant 0 : index
    %c0_23 = arith.constant 0 : index
    %39 = vector.load %arg5[%c0_22, %c0_23] : memref<2x1xi32, #tpu.memory_space<vmem>>, vector<2x1xi32>
    %40 = vector.broadcast %39 : vector<2x1xi32> to vector<2x64xi32>
    %41 = arith.cmpi sge, %38, %40 : vector<2x64xi32>
    %c0_24 = arith.constant 0 : index
    %c0_25 = arith.constant 0 : index
    %42 = vector.load %arg6[%c0_24, %c0_25] : memref<2x1xi32, #tpu.memory_space<vmem>>, vector<2x1xi32>
    %43 = vector.broadcast %42 : vector<2x1xi32> to vector<2x64xi32>
    %44 = arith.cmpi slt, %38, %43 : vector<2x64xi32>
    %45 = arith.andi %41, %44 : vector<2x64xi1>
    %c0_26 = arith.constant 0 : index
    %c0_27 = arith.constant 0 : index
    %46 = vector.load %arg7[%c0_26, %c0_27] : memref<2x1xf32, #tpu.memory_space<vmem>>, vector<2x1xf32>
    %cst_28 = arith.constant 0.000000e+00 : f32
    %47 = vector.shape_cast %46 : vector<2x1xf32> to vector<2x1xf32>
    %48 = vector.broadcast %47 : vector<2x1xf32> to vector<2x64xf32>
    %49 = vector.broadcast %cst_28 : f32 to vector<2x64xf32>
    %50 = arith.select %45, %48, %49 : vector<2x64xi1>, vector<2x64xf32>
    %c0_29 = arith.constant 0 : index
    %c0_30 = arith.constant 0 : index
    %51 = vector.load %arg15[%c0_29, %c0_30] : memref<2x1xf32, #tpu.memory_space<vmem>>, vector<2x1xf32>
    %52 = vector.broadcast %34 : vector<1x64xf32> to vector<2x64xf32>
    %53 = arith.mulf %50, %52 : vector<2x64xf32>
    %cst_31 = arith.constant dense<0.000000e+00> : vector<2xf32>
    %54 = vector.multi_reduction <add>, %53, %cst_31 [1] : vector<2x64xf32> to vector<2xf32>
    %55 = vector.shape_cast %54 : vector<2xf32> to vector<2x1xf32>
    %56 = arith.addf %51, %55 : vector<2x1xf32>
    %c0_32 = arith.constant 0 : index
    %c0_33 = arith.constant 0 : index
    %57 = vector.load %arg15[%c0_32, %c0_33] : memref<2x1xf32, #tpu.memory_space<vmem>>, vector<2x1xf32>
    tpu.vector_store %arg15[%c0_32, %c0_33], %56 {strides = array<i32>} : memref<2x1xf32, #tpu.memory_space<vmem>>, vector<2x1xf32>,
    %c0_i32_34 = arith.constant 0 : i32
    %58 = arith.cmpi eq, %arg0, %c0_i32_34 : i32
    %59 = arith.extui %58 : i1 to i32
    %c0_i32_35 = arith.constant 0 : i32
    %60 = arith.cmpi ne, %59, %c0_i32_35 : i32
    scf.if %60 {
      %c0_36 = arith.constant 0 : index
      %c0_37 = arith.constant 0 : index
      %61 = vector.load %arg15[%c0_36, %c0_37] : memref<2x1xf32, #tpu.memory_space<vmem>>, vector<2x1xf32>
      %c0_38 = arith.constant 0 : index
      %c0_39 = arith.constant 0 : index
      %62 = vector.load %arg8[%c0_38, %c0_39] : memref<1x16xf32, #tpu.memory_space<vmem>>, vector<1x16xf32>
      %63 = vector.broadcast %61 : vector<2x1xf32> to vector<2x16xf32>
      %64 = vector.broadcast %62 : vector<1x16xf32> to vector<2x16xf32>
      %65 = arith.mulf %63, %64 : vector<2x16xf32>
      %c0_40 = arith.constant 0 : index
      %c0_41 = arith.constant 0 : index
      %66 = vector.load %arg9[%c0_40, %c0_41] : memref<1x16xf32, #tpu.memory_space<vmem>>, vector<1x16xf32>
      %67 = vector.broadcast %66 : vector<1x16xf32> to vector<2x16xf32>
      %68 = arith.addf %65, %67 : vector<2x16xf32>
      %cst_42 = arith.constant 0.000000e+00 : f32
      %69 = vector.broadcast %cst_42 : f32 to vector<2x16xf32>
      %70 = arith.maximumf %68, %69 : vector<2x16xf32>
      %c0_43 = arith.constant 0 : index
      %c0_44 = arith.constant 0 : index
      %71 = vector.load %arg10[%c0_43, %c0_44] : memref<16x32xf32, #tpu.memory_space<vmem>>, vector<16x32xf32>
      %cst_45 = arith.constant dense<0.000000e+00> : vector<2x32xf32>
      %72 = tpu.matmul %70, %71, %cst_45 {dimension_numbers = #tpu.dot_dimension_numbers<[1], [0], [0], [1], [0, 0, 1, 1], [], []>} : vector<2x16xf32>, vector<16x32xf32>, vector<2x32xf32> -> vector<2x32xf32>
      %c0_46 = arith.constant 0 : index
      %c0_47 = arith.constant 0 : index
      %73 = vector.load %arg11[%c0_46, %c0_47] : memref<1x32xf32, #tpu.memory_space<vmem>>, vector<1x32xf32>
      %74 = vector.broadcast %73 : vector<1x32xf32> to vector<2x32xf32>
      %75 = arith.addf %72, %74 : vector<2x32xf32>
      %cst_48 = arith.constant 0.000000e+00 : f32
      %76 = vector.broadcast %cst_48 : f32 to vector<2x32xf32>
      %77 = arith.maximumf %75, %76 : vector<2x32xf32>
      %c0_49 = arith.constant 0 : index
      %c0_50 = arith.constant 0 : index
      %78 = vector.load %arg12[%c0_49, %c0_50] : memref<32x128xf32, #tpu.memory_space<vmem>>, vector<32x128xf32>
      %cst_51 = arith.constant dense<0.000000e+00> : vector<2x128xf32>
      %79 = tpu.matmul %77, %78, %cst_51 {dimension_numbers = #tpu.dot_dimension_numbers<[1], [0], [0], [1], [0, 0, 1, 1], [], []>} : vector<2x32xf32>, vector<32x128xf32>, vector<2x128xf32> -> vector<2x128xf32>
      %c0_52 = arith.constant 0 : index
      %c0_53 = arith.constant 0 : index
      %80 = vector.load %arg13[%c0_52, %c0_53] : memref<1x128xf32, #tpu.memory_space<vmem>>, vector<1x128xf32>
      %81 = vector.broadcast %80 : vector<1x128xf32> to vector<2x128xf32>
      %82 = arith.addf %79, %81 : vector<2x128xf32>
      %c0_54 = arith.constant 0 : index
      %c0_55 = arith.constant 0 : index
      %83 = vector.load %arg14[%c0_54, %c0_55] : memref<2x128xf32, #tpu.memory_space<vmem>>, vector<2x128xf32>
      tpu.vector_store %arg14[%c0_54, %c0_55], %82 {strides = array<i32>} : memref<2x128xf32, #tpu.memory_space<vmem>>, vector<2x128xf32>,
    } else {
    }
    return
  }
  func.func @transform_0(%arg0: i32) -> (i32, i32) {
    %c0_i32 = arith.constant 0 : i32
    %c0_i32_0 = arith.constant 0 : i32
    return %c0_i32, %arg0 : i32, i32
  }
  func.func @transform_1(%arg0: i32) -> (i32, i32) {
    %c0_i32 = arith.constant 0 : i32
    %c0_i32_0 = arith.constant 0 : i32
    %c0_i32_1 = arith.constant 0 : i32
    return %c0_i32, %c0_i32_0 : i32, i32
  }
  func.func @transform_2(%arg0: i32) -> (i32, i32) {
    %c0_i32 = arith.constant 0 : i32
    %c0_i32_0 = arith.constant 0 : i32
    %c0_i32_1 = arith.constant 0 : i32
    return %c0_i32, %c0_i32_0 : i32, i32
  }
  func.func @transform_3(%arg0: i32) -> (i32, i32) {
    %c0_i32 = arith.constant 0 : i32
    %c0_i32_0 = arith.constant 0 : i32
    %c0_i32_1 = arith.constant 0 : i32
    return %c0_i32, %c0_i32_0 : i32, i32
  }
  func.func @transform_4(%arg0: i32) -> (i32, i32) {
    %c0_i32 = arith.constant 0 : i32
    %c0_i32_0 = arith.constant 0 : i32
    %c0_i32_1 = arith.constant 0 : i32
    return %c0_i32, %c0_i32_0 : i32, i32
  }
  func.func @transform_5(%arg0: i32) -> (i32, i32) {
    %c0_i32 = arith.constant 0 : i32
    %c0_i32_0 = arith.constant 0 : i32
    %c0_i32_1 = arith.constant 0 : i32
    return %c0_i32, %c0_i32_0 : i32, i32
  }
  func.func @transform_6(%arg0: i32) -> (i32, i32) {
    %c0_i32 = arith.constant 0 : i32
    %c0_i32_0 = arith.constant 0 : i32
    %c0_i32_1 = arith.constant 0 : i32
    return %c0_i32, %c0_i32_0 : i32, i32
  }
  func.func @transform_7(%arg0: i32) -> (i32, i32) {
    %c0_i32 = arith.constant 0 : i32
    %c0_i32_0 = arith.constant 0 : i32
    %c0_i32_1 = arith.constant 0 : i32
    return %c0_i32, %c0_i32_0 : i32, i32
  }
  func.func @transform_8(%arg0: i32) -> (i32, i32) {
    %c0_i32 = arith.constant 0 : i32
    %c0_i32_0 = arith.constant 0 : i32
    %c0_i32_1 = arith.constant 0 : i32
    return %c0_i32, %c0_i32_0 : i32, i32
  }
  func.func @transform_9(%arg0: i32) -> (i32, i32) {
    %c0_i32 = arith.constant 0 : i32
    %c0_i32_0 = arith.constant 0 : i32
    %c0_i32_1 = arith.constant 0 : i32
    return %c0_i32, %c0_i32_0 : i32, i32
  }
  func.func @transform_10(%arg0: i32) -> (i32, i32) {
    %c0_i32 = arith.constant 0 : i32
    %c0_i32_0 = arith.constant 0 : i32
    %c0_i32_1 = arith.constant 0 : i32
    return %c0_i32, %c0_i32_0 : i32, i32
  }
  func.func @transform_11(%arg0: i32) -> (i32, i32) {
    %c0_i32 = arith.constant 0 : i32
    %c0_i32_0 = arith.constant 0 : i32
    %c0_i32_1 = arith.constant 0 : i32
    return %c0_i32, %c0_i32_0 : i32, i32
  }
  func.func @transform_12(%arg0: i32) -> (i32, i32) {
    %c0_i32 = arith.constant 0 : i32
    %c0_i32_0 = arith.constant 0 : i32
    %c0_i32_1 = arith.constant 0 : i32
    return %c0_i32, %c0_i32_0 : i32, i32
  }
  func.func @transform_13(%arg0: i32) -> (i32, i32) {
    %c0_i32 = arith.constant 0 : i32
    %c0_i32_0 = arith.constant 0 : i32
    %c0_i32_1 = arith.constant 0 : i32
    return %c0_i32, %c0_i32_0 : i32, i32
  }
}

</mosaic_0001>

<bundles_post_ra>
// kernel: tpu_custom_call.1
= control target key start
LH: loop header
LB: loop body
LE: loop exit
PB: predicated region body
PF: predicated region fallthrough
CT: control target
= control target key end

     0   :  { %vm107_vm0 = vcmask 130048   ;;  %v791_v3 = vmov 0   ;;  %s992_s0 = inlined_call_operand.vmem [shape: bf16[16,64], index: 0, kind: input, shape index: {}]   ;;  %s993_s1 = inlined_call_operand.vmem [shape: bf16[32,16], index: 1, kind: input, shape index: {}]   ;;  %s994_s2 = inlined_call_operand.vmem [shape: bf16[65,32], index: 2, kind: input, shape index: {}]   ;;  %s995_s3 = inlined_call_operand.vmem [shape: f32[97,1], index: 3, kind: input, shape index: {}]   ;;  %s996_s4 = inlined_call_operand.vmem [shape: s32[2,1], index: 4, kind: input, shape index: {}]   ;;  %s997_s5 = inlined_call_operand.vmem [shape: s32[2,1], index: 5, kind: input, shape index: {}]   ;;  %s998_s6 = inlined_call_operand.vmem [shape: f32[2,1], index: 6, kind: input, shape index: {}]   ;;  %s999_s7 = inlined_call_operand.vmem [shape: f32[1,16], index: 7, kind: input, shape index: {}]   ;;  %s1000_s8 = inlined_call_operand.vmem [shape: f32[1,16], index: 8, kind: input, shape index: {}]   ;;  %s1001_s9 = inlined_call_operand.vmem [shape: f32[16,32], index: 9, kind: input, shape index: {}]   ;;  %s1002_s10 = inlined_call_operand.vmem [shape: f32[1,32], index: 10, kind: input, shape index: {}]   ;;  %s1003_s11 = inlined_call_operand.vmem [shape: f32[32,128], index: 11, kind: input, shape index: {}]   ;;  %s1004_s12 = inlined_call_operand.vmem [shape: f32[1,128], index: 12, kind: input, shape index: {}]   ;;  %s1005_s13 = inlined_call_operand.hbm [shape: f32[2,128], index: 13, kind: output, shape index: {}]  }
   0x1   :  { %v760_v0 = vld [vmem:[%s992_s0] sm:$0xff]   ;;  %v762_v2 = vld [vmem:[%s993_s1 + $0x8] sm:$0xff]   ;;  %758 = vset.pattern.permute.xlu0 %v791_v3  ;;  %v56_v5 = vld [vmem:[%s995_s3 + $0x10] sm:$0xff]  ;;  %759 = vset.pattern.permute.xlu1 %v791_v3 }
   0x2   :  { %v761_v1 = vld [vmem:[%s993_s1] sm:$0xff]   ;;  %696 = vmatprep.subr.bf16.mxu0 %v760_v0  ;;  %83 = vperm.xlu1 %759, %v56_v5   ;;  %v55_v6 = vld [vmem:[%s995_s3 + $0x8] sm:$0xff]  ;;  %v57_v7 = vld [vmem:[%s995_s3 + $0x18] sm:$0xff] }
   0x3   :  { %697 = vmatpush3.bf16.msra.mxu0 %v760_v0  ;;  %698 = vmatprep.mubr.msk.bf16.mxu0 %vm107_vm0, %v761_v1  ;;  %v54_v4 = vld [vmem:[%s995_s3] sm:$0xff]  ;;  %v59_v9 = vld [vmem:[%s995_s3 + $0x28] sm:$0xff] }
   0x4   :  { %73 = vperm.xlu0 %758, %v54_v4   ;;  %v58_v8 = vld [vmem:[%s995_s3 + $0x20] sm:$0xff] }
   0x6   :  { %699 = vmatmul.mubr.msk.bf16.vlgmr.msra.gmra.mrb[0].mxu0 %vm107_vm0, %v762_v2  ;;  %88 = vperm.xlu1 %759, %v57_v7  }
   0x8   :  { %78 = vperm.xlu0 %758, %v55_v6  }
   0x9   :  { %18 = vsyncpa [#allocation4], 0  ;;  %v60_v10 = vld [vmem:[%s995_s3 + $0x30] sm:$0xff]  ;;  %v61_v11 = vld [vmem:[%s995_s3 + $0x38] sm:$0xff]  ;;  %vm203_vm1 = vcmask 261120   ;;  %v792_v60 = vmov 0.0  }
   0xa   :  { %180 = vperm.xlu1 %759, %v59_v9   ;;  %v62_v12 = vld [vmem:[%s995_s3 + $0x40] sm:$0xff]  ;;  %v63_v13 = vld [vmem:[%s995_s3 + $0x48] sm:$0xff]  ;;  %v64_v14 = vld [vmem:[%s995_s3 + $0x50] sm:$0xff]  ;;  %vm793_vm2 = vmmov 0   ;;  %vm439_vm6 = vcmask 517120   ;;  %vm50_vm7 = vcmask 1024  }
   0xb   :  { %v65_v15 = vld [vmem:[%s995_s3 + $0x58] sm:$0xff]  ;;  %v66_v16 = vld [vmem:[%s995_s3 + $0x60] sm:$0x1]  ;;  %v764_v39 = vld [vmem:[%s994_s2 + $0x8] sm:$0xff]   ;;  %51 = vst.msk [vmem:[#allocation2] sm:$0x3] %vm50_vm7, %v792_v60 }
   0xc   :  { %175 = vperm.xlu0 %758, %v58_v8   ;;  %v415_v17 = vld [vmem:[%s996_s4] sm:$0x3]  ;;  %v765_v40 = vld [vmem:[%s994_s2 + $0x10] sm:$0xff]   ;;  %v766_v59 = vld [vmem:[%s994_s2 + $0x18] sm:$0xff]   ;;  %s795_s4 = smov [#allocation3]  }
   0xd   :  { %v420_v18 = vld [vmem:[%s997_s5] sm:$0x3]  ;;  %714 = vmatprep.mubr.msk.bf16.mxu0 %vm203_vm1, %v765_v40  ;;  %s646_s5 = sshll.u32 %s795_s4, 4  ;;  %s647_s5 = int_to_ptr.vmem [resolvable:$true] %s646_s5 }
   0xe   :  { %190 = vperm.xlu1 %759, %v61_v11   ;;  %v426_v19 = vld [vmem:[%s998_s6] sm:$0x3]  ;;  %p772_p1 = scmp.lt.s32.totalorder %s647_s5, %s647_s5 }
   0xf   :  { %v763_v20 = vld [vmem:[%s994_s2] sm:$0xff]  }
  0x10   :  { %185 = vperm.xlu0 %758, %v60_v10   ;;  %706 = vmatprep.mubr.msk.bf16.mxu1 %vm203_vm1, %v763_v20 }
  0x12   :  { %276 = vperm.xlu1 %759, %v63_v13  }
  0x14   :  { %271 = vperm.xlu0 %758, %v62_v12  }
  0x16   :  { %286 = vperm.xlu1 %759, %v65_v15   ;;  %v360_v15 = vld [vmem:[%s994_s2 + $0x20] sm:$0x1] }
  0x18   :  { %281 = vperm.xlu0 %758, %v64_v14  }
  0x1a   :  { %417 = vperm.xlu1 %759, %v415_v17   ;;  %v410_v17 = vlaneseq }
  0x1c   :  { %363 = vperm.xlu0 %758, %v66_v16  }
  0x1e   :  { %429 = vperm.xlu1 %759, %v426_v19  }
  0x20   :  { %422 = vperm.xlu0 %758, %v420_v18   ;;  %v411_v18 = vand.u32 127, %v410_v17 }
  0x81   :  { %v84_v21 = vpop.permute.xlu1 %83 }
  0x83   :  { %v74_v22 = vpop.permute.xlu0 %73 }
  0x85   :  { %v89_v26 = vpop.permute.xlu1 %88 }
  0x87   :  { %v79_v29 = vpop.permute.xlu0 %78 }
  0x89   :  { %v181_v42 = vpop.permute.xlu1 %180 }
  0x8b   :  { %v176_v41 = vpop.permute.xlu0 %175 }
  0x8d   :  { %v191_v47 = vpop.permute.xlu1 %190 }
  0x8f   :  { %v186_v43 = vpop.permute.xlu0 %185 }
  0x91   :  { %v277_v62 = vpop.permute.xlu1 %276 }
  0x93   :  { %v272_v61 = vpop.permute.xlu0 %271 }
  0x95   :  { %v287_v3 = vpop.permute.xlu1 %286 }
  0x97   :  { %v282_v63 = vpop.permute.xlu0 %281 }
  0x99   :  { %v418_v19 = vpop.permute.xlu1 %417 }
  0x9a   :  { %vm419_vm3 = vcmp.ge.s32.totalorder %v411_v18, %v418_v19 }
  0x9b   :  { %v364_v16 = vpop.permute.xlu0 %363 }
  0x9f   :  { %v423_v20 = vpop.permute.xlu0 %422 }
  0xa0   :  { %vm424_vm4 = vcmp.lt.s32.totalorder %v411_v18, %v423_v20 }
  0xa1   :  { %vm425_vm5 = vmand %vm419_vm3, %vm424_vm4 }
  0xd9   :  { %v700_v23 = vpop.f32.mrb[0].mxu0 }
  0xda   :  { %v157_v24 = vadd.f32 %v700_v23, %v84_v21  ;;  %v148_v25 = vpop.f32.mrb[1].mxu0  ;;  %v435_v21 = vshrl.u32 %v410_v17, 7 }
  0xdb   :  { %v149_v27 = vadd.f32 %v148_v25, %v74_v22  ;;  %v701_v28 = vpop.f32.mrb[2].mxu0 }
  0xdc   :  { %v160_v30 = vadd.f32 %v701_v28, %v89_v26  ;;  %v151_v31 = vpop.f32.mrb[3].mxu0  ;;  %v165_v33 = vmax.f32 %v157_v24, 0.0  ;;  %v436_v24 = vsub.s32 0, %v435_v21 }
  0xdd   :  { %v152_v32 = vadd.f32 %v151_v31, %v79_v29  ;;  %v163_v35 = vmax.f32 %v149_v27, 0.0  ;;  %v430_v27 = vpop.permute.xlu1 %429 }
  0xde   :  { %v166_v34 = vmax.f32 %v160_v30, 0.0  ;;  %v432_v31 = vsel %vm425_vm5, %v430_v27, 0.0 }
  0xdf   :  { %v164_v36 = vmax.f32 %v152_v32, 0.0 }
  0xe0   :  { %v168_v37 = vpack.c.bf16 %v166_v34, %v165_v33  ;;  %v472_v34 = vld [vmem:[%s1001_s9] sm:$0xff] }
  0xe1   :  { %v167_v38 = vpack.c.bf16 %v164_v36, %v163_v35  ;;  %v473_v35 = vld [vmem:[%s1001_s9 + $0x8] sm:$0xff]  ;;  %v794_v36 = vmov 0.0|0.0  }
  0xe3   :  { %702 = vmatprep.subr.bf16.mxu1 %v167_v38 }
  0xe4   :  { %703 = vmatpush3.bf16.msra.mxu1 %v167_v38  ;;  %v433_v38 = vld [vmem:[#allocation2] sm:$0x3] }
  0xe5   :  { %704 = vmatprep.subr.bf16.mxu1 %v168_v37 }
  0xe8   :  { %705 = vmatpush3.bf16.msra.mxu1 %v168_v37  ;;  %v745_v37 = vpack.c.bf16 %v473_v35, %v472_v34 }
  0xe9   :  { %718 = vmatprep.subr.bf16.mxu1 %v792_v60 }
  0xeb   :  { %707 = vmatmul.mubr.msk.bf16.vlgmr.msra.gmra.mrb[0].mxu1 %vm203_vm1, %v764_v39 }
  0xec   :  { %722 = vmatprep.mubr.msk.bf16.mxu1 %vm793_vm2, %v792_v60 }
 0x1be   :  { %v708_v44 = vpop.f32.mrb[0].mxu1 }
 0x1bf   :  { %v253_v45 = vadd.f32 %v708_v44, %v186_v43  ;;  %v244_v46 = vpop.f32.mrb[1].mxu1  ;;  %v556_v43 = vld [vmem:[%s1003_s11 + $0x8] sm:$0xff] }
 0x1c0   :  { %v245_v48 = vadd.f32 %v244_v46, %v176_v41  ;;  %v709_v49 = vpop.f32.mrb[2].mxu1  ;;  %v669_v46 = vld [vmem:[%s1000_s8] ss:$0 sm:$0xff] }
 0x1c1   :  { %v256_v50 = vadd.f32 %v709_v49, %v191_v47  ;;  %v247_v51 = vpop.f32.mrb[3].mxu1  ;;  %v261_v53 = vmax.f32 %v253_v45, 0.0  ;;  %v668_v45 = vld [vmem:[%s999_s7] ss:$0 sm:$0xff] }
 0x1c2   :  { %v248_v52 = vadd.f32 %v247_v51, %v181_v42  ;;  %v259_v55 = vmax.f32 %v245_v48, 0.0  ;;  %v555_v42 = vld [vmem:[%s1003_s11] sm:$0xff]  ;;  %v557_v51 = vld [vmem:[%s1003_s11 + $0x10] sm:$0xff] }
 0x1c3   :  { %v262_v54 = vmax.f32 %v256_v50, 0.0  ;;  %v748_v44 = vpack.c.bf16 %v556_v43, %v555_v42 }
 0x1c4   :  { %v260_v56 = vmax.f32 %v248_v52, 0.0  ;;  %v558_v52 = vld [vmem:[%s1003_s11 + $0x18] sm:$0xff]  ;;  %s767_s11 = scalar_lea.vmem %s647_s5, 32 }
 0x1c5   :  { %v264_v57 = vpack.c.bf16 %v262_v54, %v261_v53  ;;  %v751_v53 = vpack.c.bf16 %v558_v52, %v557_v51  ;;  %v670_v54 = vld [vmem:[%s1002_s10] ss:$0 sm:$0xff]  ;;  %p768_p0 = scmp.ne.s32.totalorder %s647_s5, %s767_s11  ;;  %p773_p2 = scmp.lt.s32.totalorder %s767_s11, %s767_s11 }
 0x1c6   :  { %v263_v58 = vpack.c.bf16 %v260_v56, %v259_v55 }
 0x1c7   :  { %p774_p3 = por %p773_p2, %p772_p1 }
 0x1c8   :  { %710 = vmatprep.subr.bf16.mxu0 %v263_v58 }
 0x1c9   :  { %711 = vmatpush3.bf16.msra.mxu0 %v263_v58  ;;  %p775_p4 = pnand %p774_p3, %p768_p0 }
 0x1ca   :  { %712 = vmatprep.subr.bf16.mxu0 %v264_v57 }
 0x1cd   :  { %713 = vmatpush3.bf16.msra.mxu0 %v264_v57 }
 0x1ce   :  { %744 = vmatprep.subr.bf16.mxu0 %v794_v36 }
 0x1d0   :  { %715 = vmatmul.mubr.msk.bf16.vlgmr.msra.gmra.mrb[4].mxu0 %vm203_vm1, %v766_v59  ;;  %v672_v59 = vld [vmem:[%s1004_s12] ss:$0 sm:$0xff] }
 0x1d1   :  { %730 = vmatprep.mubr.msk.f32.mxu0 %vm793_vm2, %v792_v60  ;;  %746 = vmatpush3.bf16.msra.mxu0 %v745_v37 }
 0x2a3   :  { %v716_v0 = vpop.f32.mrb[4].mxu0 }
 0x2a4   :  { %v348_v1 = vadd.f32 %v716_v0, %v282_v63  ;;  %v339_v2 = vpop.f32.mrb[5].mxu0 }
 0x2a5   :  { %v340_v4 = vadd.f32 %v339_v2, %v272_v61  ;;  %v717_v5 = vpop.f32.mrb[6].mxu0 }
 0x2a6   :  { %v351_v6 = vadd.f32 %v717_v5, %v287_v3  ;;  %v342_v7 = vpop.f32.mrb[7].mxu0  ;;  %v356_v9 = vmax.f32 %v348_v1, 0.0 }
 0x2a7   :  { %v343_v8 = vadd.f32 %v342_v7, %v277_v62  ;;  %v354_v11 = vmax.f32 %v340_v4, 0.0 }
 0x2a8   :  { %v357_v10 = vmax.f32 %v351_v6, 0.0 }
 0x2a9   :  { %v355_v12 = vmax.f32 %v343_v8, 0.0 }
 0x2aa   :  { %v359_v13 = vpack.c.bf16 %v357_v10, %v356_v9 }
 0x2ab   :  { %v358_v14 = vpack.c.bf16 %v355_v12, %v354_v11 }
 0x2ad   :  { %719 = vmatpush3.bf16.msra.mxu1 %v358_v14 }
 0x2ae   :  { %720 = vmatprep.subr.bf16.mxu1 %v792_v60 }
 0x2b1   :  { %721 = vmatpush3.bf16.msra.mxu1 %v359_v13 }
 0x2b2   :  { %747 = vmatprep.subr.bf16.mxu1 %v794_v36 }
 0x2b4   :  { %723 = vmatmul.mubr.msk.bf16.vlgmr.msra.gmra.mrb[4].mxu1 %vm203_vm1, %v360_v15 }
 0x2b5   :  { %741 = vmatprep.mubr.msk.f32.mxu1 %vm793_vm2, %v792_v60  ;;  %749 = vmatpush3.bf16.msra.mxu1 %v748_v44 }
 0x2b6   :  { %750 = vmatprep.subr.bf16.mxu1 %v794_v36 }
 0x2b9   :  { %752 = vmatpush3.bf16.msra.mxu1 %v751_v53 }
 0x387   :  { %v403_v22 = vpop.f32.mrb[4].mxu1 }
 0x388   :  { %v404_v23 = vadd.f32 %v403_v22, %v364_v16  ;;  %v724_v25 = vpop.f32.mrb[5].mxu1 }
 0x389   :  { %v406_v26 = vpop.f32.mrb[6].mxu1 }
 0x38a   :  { %v409_v28 = vmax.f32 %v404_v23, 0.0  ;;  %v725_v29 = vpop.f32.mrb[7].mxu1 }
 0x38c   :  { %v437_v30 = vrot.slane %v409_v28, %v436_v24 }
 0x38e   :  { %v438_v32 = vmul.f32 %v437_v30, %v432_v31 }
 0x390   :  { %v440_v33 = vsel %vm439_vm6, %v438_v32, 0.0 }
 0x391   :  { %441 = vadd.xlane.f32.xlu0 %v440_v33 }
 0x41e   :  { %v442_v39 = vpop.xlane.xlu0 %441 }
 0x41f   :  { %v443_v40 = vadd.f32 %v442_v39, %v433_v38 }
 0x421   :  { %445 = vst.msk [vmem:[#allocation2] sm:$0x3] %vm50_vm7, %v443_v40 }
 0x428   :  { %v449_v41 = vld [vmem:[#allocation2] sm:$0x3] }
 0x429   :  { %453 = vperm.xlu1 %759, %v449_v41  }
 0x4a8   :  { %v454_v47 = vpop.permute.xlu1 %453 }
 0x4a9   :  { %v462_v48 = vmul.f32 %v668_v45, %v454_v47 }
 0x4ab   :  { %v470_v49 = vadd.f32 %v669_v46, %v462_v48 }
 0x4ad   :  { %v471_v50 = vmax.f32 %v470_v49, 0.0 }
 0x4af   :  { %731 = vmatmul.mubr.msk.f32.vlgmr.msra.gmra.mrb[8].mxu0 %vm107_vm0, %v471_v50 }
 0x582   :  { %v550_v55 = vpop.f32.mrb[8].mxu0 }
 0x583   :  { %v551_v56 = vadd.f32 %v670_v54, %v550_v55  ;;  %v732_v57 = vpop.f32.mrb[9].mxu0 }
 0x585   :  { %v554_v58 = vmax.f32 %v551_v56, 0.0 }
 0x587   :  { %742 = vmatmul.mubr.msk.f32.vlgmr.msra.gmra.mrb[8].mxu1 %vm203_vm1, %v554_v58 }
 0x65a   :  { %v635_v60 = vpop.f32.mrb[8].mxu1 }
 0x65b   :  { %v636_v61 = vadd.f32 %v672_v59, %v635_v60  ;;  %v743_v62 = vpop.f32.mrb[9].mxu1 }
 0x65d   :  { %639 = vst [vmem:[#allocation3] sm:$0x3] %v636_v61 }
 0x65e   :  { %778 = shalt.err (!%p775_p4)
}
 0x65f   :  { %s779_s27 = scalar_lea.hbm %s1005_s13, 32 }
 0x660   :  { %p780_p5 = scmp.ne.s32.totalorder %s1005_s13, %s779_s27  ;;  %p783_p6 = scmp.lt.u32.totalorder %s779_s27, %s1005_s13 }
 0x662   :  { %p785_p7 = pnand %p783_p6, %p780_p5 }
 0x664   :  { %788 = shalt.err (!%p785_p7)
}
 0x665   :  { %649 = dma.vmem_to_hbm [thread:$0]  %s647_s5, 32, %s1005_s13, [#allocation4]  }
 0x666   :  { %789 = dma.done.wait [#allocation4], 32  }
 0x667   :  { %790 = vsyncadd [#allocation4], 4294967264 }
 0x668   :  { %653 = vsyncpa [#allocation4], 1 }

</bundles_post_ra>
